<compile_context>
chip_gen: v5e
topology: v5e:2x2
jax: 0.10.0
libtpu: 0.0.40
codegen_flags: <defaults>
</compile_context>

<pallas_src>
import functools

import jax
import jax.numpy as jnp
from jax import lax
from jax.experimental import pallas as pl
from jax.experimental.pallas import tpu as pltpu


def _round_up(x, m):
    return -(-x // m) * m


def _vmem_capacity_bytes():
    try:
        info = pltpu.get_tpu_info()
        cap = getattr(info, "vmem_capacity_bytes", None)
        if cap:
            return int(cap)
    except Exception:
        pass
    return 64 << 20  # conservative default (v7x per-TC physical VMEM)


def _ls_ce_kernel(lprobs_ref, target_ref, partial_ref, *,
                  smoothing, ignore_index, vocab_size, n_rows, block_rows):
    i = pl.program_id(0)

    lp = lprobs_ref[...]                  # (TM, V), kept in the input dtype (bf16 stays bf16)
    tgt = target_ref[...]                 # (TM, 1) int32

    # Two per-row lane reductions with f32 accumulation.  The gather is a
    # compare/select (not a multiply), so -inf lprobs in non-target columns
    # cannot produce NaN.
    col = lax.broadcasted_iota(jnp.int32, lp.shape, 1)
    picked = jnp.where(col == tgt, lp, jnp.zeros_like(lp))                      # (TM, V)
    nll_row = jnp.sum(picked, axis=-1, keepdims=True, dtype=jnp.float32)        # (TM, 1)
    smooth_row = jnp.sum(lp, axis=-1, keepdims=True, dtype=jnp.float32)         # (TM, 1)

    # Parity with the original module: eps_i = smoothing / V, coeff (1 - smoothing).
    eps_i = smoothing / vocab_size
    loss_row = (1.0 - smoothing) * nll_row + eps_i * smooth_row                 # (TM, 1)

    # Mask per ROW, AFTER the reductions: out-of-bounds rows of the last block
    # (undefined VMEM contents) and ignore_index rows are dropped via a select,
    # matching the reference's masked_fill-after-gather semantics (NaN-safe).
    row = i * block_rows + lax.broadcasted_iota(jnp.int32, tgt.shape, 0)        # (TM, 1)
    valid = row < n_rows
    if ignore_index is not None:
        valid = valid & (tgt != ignore_index)
    loss_row = jnp.where(valid, loss_row, 0.0)

    partial = -jnp.sum(loss_row)                                                # scalar f32
    # Splat into this block's private (1, 8, 128) output tile; distinct tiles
    # per grid step keep the "parallel" axis race-free.
    partial_ref[...] = jnp.full(partial_ref.shape, partial, jnp.float32)


def label_smoothed_cross_entropy(lprobs, target, *, smoothing,
                                 ignore_index=None, block_rows=None,
                                 target_tile_bytes=None):
    """Reduce=True path of LabelSmoothedCrossEntropyCriterion.forward."""
    V = lprobs.shape[-1]
    lp2 = lprobs.reshape(-1, V)
    if target.ndim == lprobs.ndim:
        target = target[..., 0]
    tgt2 = target.reshape(-1, 1).astype(jnp.int32)
    N = lp2.shape[0]

    itemsize = jnp.dtype(lp2.dtype).itemsize
    # Min sublane tile: 8 for f32, 16 for bf16, 32 for int8/fp8.
    sub_mult = max(8, 32 // itemsize)

    vmem_cap = _vmem_capacity_bytes()
    headroom = 8 << 20                     # compiler scratch headroom
    if target_tile_bytes is None:
        # ~3.5x tile (double-buffered input + intermediates) + slack must fit
        # under the scoped clamp -> ~20 MiB tiles on 128 MiB chips, ~9 MiB on v7x.
        target_tile_bytes = max(2 << 20, (vmem_cap - headroom) // 6)

    if block_rows is None:
        rows = max(sub_mult, target_tile_bytes // max(1, V * itemsize))
        block_rows = max(sub_mult, min((int(rows) // sub_mult) * sub_mult, 4096))
    else:
        block_rows = _round_up(int(block_rows), sub_mult)
    # Never larger than the (sublane-rounded) number of rows.
    block_rows = min(block_rows, _round_up(N, sub_mult))
    # Respect the VMEM budget even for user-supplied block_rows.
    max_tile_bytes = max(1 << 20, (vmem_cap - headroom) // 4)
    max_rows = max(sub_mult,
                   (max_tile_bytes // max(1, V * itemsize)) // sub_mult * sub_mult)
    block_rows = max(sub_mult, min(block_rows, max_rows))
    # Guarantee >= 2 grid steps when possible so the "parallel" axis can split
    # across both TensorCores (v7x megacore).
    if pl.cdiv(N, block_rows) < 2 and N > sub_mult:
        block_rows = max(sub_mult, _round_up(-(-N // 2), sub_mult))

    num_blocks = pl.cdiv(N, block_rows)    # no HBM-side padding of lprobs

    tile_bytes = block_rows * V * itemsize
    # 2x tile (double-buffered lprobs) + ~1.5x tile intermediates + slack,
    # clamped below physical capacity with headroom for compiler scratch.
    vmem_limit = int(min(max(vmem_cap - headroom, 16 << 20),
                         max(32 << 20, int(3.5 * tile_bytes) + (4 << 20))))

    kernel = functools.partial(
        _ls_ce_kernel,
        smoothing=float(smoothing),
        ignore_index=None if ignore_index is None else int(ignore_index),
        vocab_size=V,
        n_rows=N,
        block_rows=block_rows,
    )

    partials = pl.pallas_call(
        kernel,
        out_shape=jax.ShapeDtypeStruct((num_blocks, 8, 128), jnp.float32),
        grid_spec=pltpu.PrefetchScalarGridSpec(
            num_scalar_prefetch=0,
            grid=(num_blocks,),
            in_specs=[
                pl.BlockSpec((block_rows, V), lambda i: (i, 0)),
                pl.BlockSpec((block_rows, 1), lambda i: (i, 0)),
            ],
            out_specs=pl.BlockSpec((1, 8, 128), lambda i: (i, 0, 0)),
        ),
        compiler_params=pltpu.CompilerParams(
            dimension_semantics=("parallel",),
            vmem_limit_bytes=vmem_limit,
        ),
    )(lp2, tgt2)

    return jnp.sum(partials[:, 0, 0])


def _reference(lprobs, target, smoothing, ignore_index):
    V = lprobs.shape[-1]
    lp2 = lprobs.reshape(-1, V).astype(jnp.float32)
    tgt2 = target.reshape(-1).astype(jnp.int32)
    nll = -jnp.take_along_axis(lp2, tgt2[:, None], axis=-1)[:, 0]
    smooth = -jnp.sum(lp2, axis=-1)
    if ignore_index is not None:
        mask = tgt2 == ignore_index
        nll = jnp.where(mask, 0.0, nll)
        smooth = jnp.where(mask, 0.0, smooth)
    eps_i = smoothing / V
    return (1.0 - smoothing) * jnp.sum(nll) + eps_i * jnp.sum(smooth)


if __name__ == "__main__":
    key = jax.random.PRNGKey(0)
    smoothing = 0.1

    # Case 1: f32, ignore_index set, auto block sizing (auto-splits into >= 2 blocks).
    B, T, V = 2, 8, 128
    ignore_index = 1
    k1, k2, k3, key = jax.random.split(key, 4)
    logits = jax.random.normal(k1, (B, T, V), dtype=jnp.float32)
    lprobs = jax.nn.log_softmax(logits, axis=-1)
    target = jax.random.randint(k2, (B, T), 0, V, dtype=jnp.int32)
    target = jnp.where(jax.random.bernoulli(k3, 0.25, (B, T)), ignore_index, target)

    loss1 = jax.block_until_ready(label_smoothed_cross_entropy(
        lprobs, target, smoothing=smoothing, ignore_index=ignore_index))
    ref1 = _reference(lprobs, target, smoothing, ignore_index)
    assert jnp.allclose(loss1, ref1, rtol=1e-5, atol=1e-5), (loss1, ref1)

    # Case 2: same data, forced small block -> multi-block "parallel" grid.
    loss2 = jax.block_until_ready(label_smoothed_cross_entropy(
        lprobs, target, smoothing=smoothing, ignore_index=ignore_index,
        block_rows=8))
    assert jnp.allclose(loss2, ref1, rtol=1e-5, atol=1e-5), (loss2, ref1)

    # Case 3: bf16 lprobs, no ignore_index, N (=14) smaller than the bf16
    # sublane tile -> single block whose tail rows are out-of-bounds reads,
    # masked per-row after the reduction (no HBM padding anywhere).
    B3, T3, V3 = 2, 7, 256
    k4, k5, key = jax.random.split(key, 3)
    logits3 = jax.random.normal(k4, (B3, T3, V3), dtype=jnp.float32)
    lprobs3 = jax.nn.log_softmax(logits3, axis=-1).astype(jnp.bfloat16)
    target3 = jax.random.randint(k5, (B3, T3), 0, V3, dtype=jnp.int32)

    loss3 = jax.block_until_ready(label_smoothed_cross_entropy(
        lprobs3, target3, smoothing=smoothing, ignore_index=None))
    ref3 = _reference(lprobs3, target3, smoothing, None)
    assert jnp.allclose(loss3, ref3, rtol=1e-4, atol=1e-4), (loss3, ref3)

    # Case 4: f32, N=20 not a multiple of block_rows=8 -> cdiv grid with a
    # partially out-of-bounds last block, plus ignore_index masking.
    B4, T4, V4 = 4, 5, 128
    k6, k7, k8, key = jax.random.split(key, 4)
    logits4 = jax.random.normal(k6, (B4, T4, V4), dtype=jnp.float32)
    lprobs4 = jax.nn.log_softmax(logits4, axis=-1)
    target4 = jax.random.randint(k7, (B4, T4), 0, V4, dtype=jnp.int32)
    target4 = jnp.where(jax.random.bernoulli(k8, 0.3, (B4, T4)), ignore_index, target4)

    loss4 = jax.block_until_ready(label_smoothed_cross_entropy(
        lprobs4, target4, smoothing=smoothing, ignore_index=ignore_index,
        block_rows=8))
    ref4 = _reference(lprobs4, target4, smoothing, ignore_index)
    assert jnp.allclose(loss4, ref4, rtol=1e-5, atol=1e-5), (loss4, ref4)

    print("KERNEL_OK")
</pallas_src>

<mosaic_0001>
module attributes {stable_mosaic.version = 11 : i64} {
  func.func @_ls_ce_kernel(%arg0: i32, %arg1: memref<8x128xf32, #tpu.memory_space<vmem>>, %arg2: memref<8x1xi32, #tpu.memory_space<vmem>>, %arg3: memref<1x8x128xf32, #tpu.memory_space<vmem>>) attributes {dimension_semantics = [#tpu.dimension_semantics<parallel>], iteration_bounds = array<i64: 2>, scalar_prefetch = 0 : i64, scratch_operands = 0 : i64, tpu.core_type = #tpu.core_type<tc>, window_params = [{transform_indices = @transform_0, window_bounds = array<i64: 8, 128>}, {transform_indices = @transform_1, window_bounds = array<i64: 8, 1>}, {transform_indices = @transform_2, window_bounds = array<i64: 1, 8, 128>}]} {
    %c0 = arith.constant 0 : index
    %c0_0 = arith.constant 0 : index
    %0 = vector.load %arg1[%c0, %c0_0] : memref<8x128xf32, #tpu.memory_space<vmem>>, vector<8x128xf32>
    %c0_1 = arith.constant 0 : index
    %c0_2 = arith.constant 0 : index
    %1 = vector.load %arg2[%c0_1, %c0_2] : memref<8x1xi32, #tpu.memory_space<vmem>>, vector<8x1xi32>
    %2 = tpu.iota {dimensions = array<i32: 1>} : vector<8x128xi32>
    %3 = vector.broadcast %1 : vector<8x1xi32> to vector<8x128xi32>
    %4 = arith.cmpi eq, %2, %3 : vector<8x128xi32>
    %cst = arith.constant 0.000000e+00 : f32
    %5 = vector.broadcast %cst : f32 to vector<8x128xf32>
    %6 = arith.select %4, %0, %5 : vector<8x128xi1>, vector<8x128xf32>
    %cst_3 = arith.constant dense<0.000000e+00> : vector<8xf32>
    %7 = vector.multi_reduction <add>, %6, %cst_3 [1] : vector<8x128xf32> to vector<8xf32>
    %8 = vector.shape_cast %7 : vector<8xf32> to vector<8x1xf32>
    %cst_4 = arith.constant dense<0.000000e+00> : vector<8xf32>
    %9 = vector.multi_reduction <add>, %0, %cst_4 [1] : vector<8x128xf32> to vector<8xf32>
    %10 = vector.shape_cast %9 : vector<8xf32> to vector<8x1xf32>
    %cst_5 = arith.constant 0.899999976 : f32
    %11 = vector.broadcast %cst_5 : f32 to vector<8x1xf32>
    %12 = arith.mulf %11, %8 : vector<8x1xf32>
    %cst_6 = arith.constant 7.812500e-04 : f32
    %13 = vector.broadcast %cst_6 : f32 to vector<8x1xf32>
    %14 = arith.mulf %13, %10 : vector<8x1xf32>
    %15 = arith.addf %12, %14 : vector<8x1xf32>
    %c8_i32 = arith.constant 8 : i32
    %16 = arith.muli %arg0, %c8_i32 : i32
    %17 = tpu.iota {dimensions = array<i32: 0>} : vector<8x1xi32>
    %18 = vector.broadcast %16 : i32 to vector<8x1xi32>
    %19 = arith.addi %18, %17 : vector<8x1xi32>
    %c16_i32 = arith.constant 16 : i32
    %20 = vector.broadcast %c16_i32 : i32 to vector<8x1xi32>
    %21 = arith.cmpi slt, %19, %20 : vector<8x1xi32>
    %c1_i32 = arith.constant 1 : i32
    %22 = vector.broadcast %c1_i32 : i32 to vector<8x1xi32>
    %23 = arith.cmpi ne, %1, %22 : vector<8x1xi32>
    %24 = arith.andi %21, %23 : vector<8x1xi1>
    %cst_7 = arith.constant 0.000000e+00 : f32
    %25 = vector.broadcast %cst_7 : f32 to vector<8x1xf32>
    %26 = arith.select %24, %15, %25 : vector<8x1xi1>, vector<8x1xf32>
    %27 = vector.shape_cast %26 : vector<8x1xf32> to vector<1x8x1xf32>
    %cst_8 = arith.constant dense<0.000000e+00> : vector<1xf32>
    %28 = vector.multi_reduction <add>, %27, %cst_8 [1, 2] : vector<1x8x1xf32> to vector<1xf32>
    %29 = vector.shape_cast %28 : vector<1xf32> to vector<1x1x1xf32>
    %30 = vector.extract %29[0, 0, 0] : f32 from vector<1x1x1xf32>
    %cst_9 = arith.constant 0.000000e+00 : f32
    %31 = arith.subf %cst_9, %30 : f32
    %32 = vector.broadcast %31 : f32 to vector<1x8x128xf32>
    %c0_10 = arith.constant 0 : index
    %c0_11 = arith.constant 0 : index
    %c0_12 = arith.constant 0 : index
    %33 = vector.load %arg3[%c0_10, %c0_11, %c0_12] : memref<1x8x128xf32, #tpu.memory_space<vmem>>, vector<1x8x128xf32>
    tpu.vector_store %arg3[%c0_10, %c0_11, %c0_12], %32 {strides = array<i32>} : memref<1x8x128xf32, #tpu.memory_space<vmem>>, vector<1x8x128xf32>,
    return
  }
  func.func @transform_0(%arg0: i32) -> (i32, i32) {
    %c0_i32 = arith.constant 0 : i32
    %c0_i32_0 = arith.constant 0 : i32
    return %arg0, %c0_i32 : i32, i32
  }
  func.func @transform_1(%arg0: i32) -> (i32, i32) {
    %c0_i32 = arith.constant 0 : i32
    %c0_i32_0 = arith.constant 0 : i32
    return %arg0, %c0_i32 : i32, i32
  }
  func.func @transform_2(%arg0: i32) -> (i32, i32, i32) {
    %c0_i32 = arith.constant 0 : i32
    %c0_i32_0 = arith.constant 0 : i32
    %c0_i32_1 = arith.constant 0 : i32
    return %arg0, %c0_i32, %c0_i32_0 : i32, i32, i32
  }
}

</mosaic_0001>

<bundles_post_ra>
// kernel: tpu_custom_call.1
= control target key start
LH: loop header
LB: loop body
LE: loop exit
PB: predicated region body
PF: predicated region fallthrough
CT: control target
= control target key end

     0   :  { %7 = vsyncpa [#allocation3], 0  ;;  %s505_s0 = inlined_call_operand.vmem [shape: f32[16,128], index: 0, kind: input, shape index: {}]   ;;  %s506_s1 = inlined_call_operand.vmem [shape: s32[16,1], index: 1, kind: input, shape index: {}]   ;;  %s507_s2 = inlined_call_operand.hbm [shape: f32[2,8,128], index: 2, kind: output, shape index: {}]  }
   0x1   :  { %9 = vsyncpa [#allocation3 + $0x1], 0  ;;  %s417_s9 = smov 0   ;;  %s419_s10 = smov 0  }
   0x2   :  { %s421_s11 = smov 0   ;;  %s423_s12 = smov 0  }
   0x3 LB: > { %s438_s13 = sadd.s32 4294967295, %s399_s12   ;;  %s282_s14 = sadd.s32 4294967294, %s399_s12   ;;  %s399_s12 = sphi %s423_s12, %s513_s12   ;;  %s395_s11 = sphi %s421_s11, %s512_s11   ;;  %s391_s10 = sphi %s419_s10, %s511_s10   ;;  %s387_s9 = sphi %s417_s9, %s510_s9  }
   0x4   : > { %s442_s15 = sadd.s32 1, %s399_s12   ;;  %s74_s16 = sadd.s32 1, %s395_s11 }
   0x5   : > { %s71_s17 = ssub.s32 %s399_s12, %s442_s15  ;;  %p84_p0 = scmp.ne.s32.totalorder %s395_s11, %s391_s10 }
   0x6   : > { %p72_p1 = scmp.eq.s32.totalorder %s71_s17, 0  ;;  %p85_p2 = scmp.eq.s32.totalorder %s438_s13, 1 }
   0x7   : > { %p90_p3 = scmp.ne.s32.totalorder %s391_s10, %s387_s9  ;;  %p91_p4 = scmp.eq.s32.totalorder %s282_s14, 1 }
   0x8   : > { %s453_s18 = scalar_select %p72_p1, %s395_s11, %s74_s16  }
   0x9   : > { %p455_p5 = por %p85_p2, %p84_p0  ;;  %p459_p6 = por %p91_p4, %p90_p3 }
   0xa   : > { %p285_p7 = scmp.ge.s32.totalorder %s399_s12, 1  ;;  %p123_p8 = scmp.lt.s32.totalorder %s399_s12, 3 }
   0xc   : > { %p124_p9 = pnand %p285_p7, %p123_p8 }
   0xd   : > { %p148_p10 = scmp.lt.s32.totalorder (!%p124_p9), %s438_s13, 1  ;;  %s289_s29 = sshll.u32 (!%p124_p9), %s438_s13, 3 }
   0xe   : > { %127 = sbr.rel (%p124_p9) target bundleno = 447 (0x1bf), region = 28  ;;  %s145_s30 = sand.u32 (!%p124_p9), 1, %s391_s10  }
   0xf   : > { %s286_s3 = sshll.u32 (!%p124_p9), %s145_s30, 3  ;;  %s206_s6 = scalar_lea.hbm (!%p124_p9), %s507_s2, %s289_s29 }
  0x10   : > { %s147_s7 = scalar_lea.vmem (!%p124_p9), [#allocation2], %s286_s3  ;;  %s196_s17 = scalar_lea.sflag (!%p124_p9), [#allocation3], %s145_s30 }
  0x11   : > { %s208_s8 = sshll.u32 (!%p124_p9), %s147_s7, 4  ;;  %s209_s8 = int_to_ptr.vmem [resolvable:$true] %s208_s8 }
  0x13   : > { %v401_v0 = vmov 0   ;;  %s149_s21 = scalar_select %p148_p10, %s438_s13, 1  ;;  %v158_v3 = vlaneseq  ;;  %v175_v8 = vstv %s289_s29  ;;  %vm181_vm4 = vcmask 7168  }
  0x14   : > { %336 = vset.pattern.permute.xlu0 %v401_v0  ;;  %s210_s13 = sshll.u32 %s206_s6, 4  ;;  %s211_s13 = int_to_ptr.hbm [resolvable:$true] %s210_s13 }
  0x15   : > { %s287_s22 = sshll.u32 %s149_s21, 3  ;;  %v159_v4 = vand.u32 127, %v158_v3  ;;  %v174_v7 = vshrl.u32 %v158_v3, 7  ;;  %s351_s21 = sshra.s32 %s211_s13, 4  ;;  %s352_s21 = int_to_ptr.hbm [resolvable:$true] %s351_s21 }
  0x16   : > { %s155_s25 = scalar_lea.vmem %s506_s1, %s287_s22  ;;  %s151_s28 = scalar_lea.vmem %s505_s0, %s287_s22 }
  0x17   : > { %v157_v1 = vld [vmem:[%s155_s25] sm:$0xff]  ;;  %v176_v9 = vadd.s32 %v175_v8, %v174_v7  ;;  %s353_s22 = scalar_lea.hbm %s352_s21, 8  ;;  %s357_s25 = scalar_lea.hbm %s507_s2, 16 }
  0x18   : > { %161 = vperm.xlu0 %336, %v157_v1   ;;  %v156_v2 = vld [vmem:[%s151_s28] sm:$0xff]  ;;  %vm178_vm1 = vcmp.ne.s32.totalorder %v157_v1, 1  ;;  %p354_p11 = scmp.ne.s32.totalorder %s352_s21, %s353_s22  ;;  %p358_p0 = scmp.lt.s32.totalorder %s352_s21, %s507_s2 }
  0x19   : > { %167 = vadd.xlane.f32.xlu1 %v156_v2  ;;  %vm177_vm2 = vcmp.lt.s32.totalorder %v176_v9, 16  ;;  %p359_p1 = scmp.lt.s32.totalorder %s357_s25, %s353_s22 }
  0x1a   : > { %vm179_vm3 = vmand %vm177_vm2, %vm178_vm1  ;;  %p355_p12 = pnand %p354_p11, %p455_p5 }
  0x1b   : > { %p360_p2 = por %p359_p1, %p358_p0 }
  0x1c   : > { %p356_p13 = pneg %p355_p12 }
  0x1e   : > { %p361_p3 = pnand %p360_p2, %p356_p13 }
  0x8a   : > { %v162_v5 = vpop.permute.xlu0 %161 }
  0x8b   : > { %vm163_vm0 = vcmp.eq.s32.totalorder %v159_v4, %v162_v5 }
  0x8c   : > { %v164_v6 = vsel %vm163_vm0, %v156_v2, 0.0  ;;  %v168_v10 = vpop.xlane.xlu1 %167 }
  0x8d   : > { %165 = vadd.xlane.f32.xlu0 %v164_v6  ;;  %v170_v11 = vmul.f32 0.00078125, %v168_v10 }
 0x100   : > { %v166_v12 = vpop.xlane.xlu0 %165 }
 0x101   : > { %v169_v13 = vmul.f32 0.9, %v166_v12 }
 0x103   : > { %v171_v14 = vadd.f32 %v170_v11, %v169_v13 }
 0x105   : > { %v180_v15 = vsel %vm179_vm3, %v171_v14, 0.0 }
 0x106   : > { %v182_v16 = vsel %vm181_vm4, %v180_v15, 0.0 }
 0x107   : > { %183 = vadd.xlane.f32.xlu1 %v182_v16 }
 0x17a   : > { %v184_v17 = vpop.xlane.xlu1 %183 }
 0x17b   : > { %v185_v18 = vrot.slane %v184_v17, 4 }
 0x17d   : > { %v186_v19 = vadd.f32 %v185_v18, %v184_v17 }
 0x17f   : > { %v187_v20 = vrot.slane %v186_v19, 2 }
 0x181   : > { %v188_v21 = vadd.f32 %v187_v20, %v186_v19 }
 0x183   : > { %v189_v22 = vrot.slane %v188_v21, 1 }
 0x185   : > { %v190_v23 = vadd.f32 %v189_v22, %v188_v21 }
 0x187   : > { %294 = vpush %v190_v23 }
 0x1b8   : > { %s295_s14 = spop %294 }
 0x1b9   : > { %s192_s16 = ssub.f32 0.0, %s295_s14 }
 0x1bb   : > { %v193_v24 = vstv %s192_s16 }
 0x1bc   : > { %194 = vst [vmem:[%s147_s7] sm:$0xff] %v193_v24 }
 0x1bd   : > { %364 = shalt.err (!%p361_p3)
}
 0x1be   : > { %296 = dma.vmem_to_hbm [thread:$0]  (%p455_p5), %s209_s8, 128, %s211_s13, %s196_s17  }
 0x1bf PF: > { %p302_p4 = scmp.ge.s32.totalorder %s399_s12, 2  ;;  %s222_s28 = sand.u32 1, %s387_s9  }
 0x1c0   : > { %s223_s29 = scalar_lea.sflag [#allocation3], %s222_s28 }
 0x1c1   : > { %p299_p7 = pnand %p302_p4, %p459_p6 }
 0x1c3   : > { %p300_p8 = pneg %p299_p7 }
 0x1c5   : > { %382 = dma.done.wait (%p300_p8), %s223_s29, 128  }
 0x1c6   : > { %384 = vsyncadd (%p300_p8), %s223_s29, 4294967168  ;;  %p12_p9 = scmp.ge.s32.totalorder %s442_s15, 4   ;;  %s510_s9 = smov %s391_s10 }
 0x1c7   : > { %s511_s10 = smov %s395_s11  ;;  %s512_s11 = smov %s453_s18 }
 0x1c8   : > { %s513_s12 = smov %s442_s15  ;;  %14 = sbr.rel (!%p12_p9) target bundleno = 3 (0x3), region = 66 }
 0x1cd   :  { %229 = vsyncpa [#allocation3], 1 }
 0x1ce   :  { %231 = vsyncpa [#allocation3 + $0x1], 1 }

</bundles_post_ra>
